<compile_context>
chip_gen: v5e
topology: v5e:2x2
jax: 0.10.0
libtpu: 0.0.40
codegen_flags: <defaults>
</compile_context>

<pallas_src>
import functools

import jax
import jax.numpy as jnp
from jax import lax
from jax.experimental import pallas as pl
from jax.experimental.pallas import tpu as pltpu


_EPS = 1e-8
_VMEM_LIMIT = 32 * 1024 * 1024    # safe to request on v5e/v6e (128 MiB phys) and v7x (64 MiB phys)
_TILE_BUDGET = 20 * 1024 * 1024   # target for double-buffered tile footprint (headroom under 32 MiB)


def _round_up(n, m):
    return ((n + m - 1) // m) * m


def _largest_divisor_leq(n, cap):
    """Largest divisor of n that is <= cap (n >= 1, cap >= 1)."""
    cap = max(1, min(cap, n))
    for d in range(cap, 0, -1):
        if n % d == 0:
            return d
    return 1


def _pick_mn_tile(extent, align, cap, max_waste_frac=0.125):
    """Tile size (multiple of `align`) for an already `align`-aligned `extent`.

    Single full block when extent fits under `cap`; otherwise the largest tile whose
    round-up padding stays under `max_waste_frac` (falls back to `align`, which never pads)."""
    if extent <= cap:
        return extent
    max_waste = int(extent * max_waste_frac)
    for c in range(cap, align - 1, -align):
        if _round_up(extent, c) - extent <= max_waste:
            return c
    return align


# -----------------------------------------------------------------------------------------
# Pairwise (SimCSE) path: out[i, j] = cos(x[i], y[j]) / temp, computed on the MXU.
# -----------------------------------------------------------------------------------------
def _pairwise_fullk_kernel(x_ref, y_ref, o_ref, *, inv_temp, eps2, precision):
    x = x_ref[...]
    y = y_ref[...]
    # (tm, K) x (tn, K) -> (tm, tn): contract the feature axis (flash-attn style Q.K^T feed),
    # f32 accumulation on the MXU, single dot (no per-k accumulator read-modify-write).
    dots = lax.dot_general(x, y, (((1,), (1,)), ((), ())),
                           preferred_element_type=jnp.float32,
                           precision=precision)
    xf = x.astype(jnp.float32)
    yf = y.astype(jnp.float32)
    # Row norms from the tiles already resident in VMEM: O((tm+tn)*K) VPU work, negligible
    # next to the O(tm*tn*K) matmul, and no separate HBM pass / extra operands.
    xsq = jnp.sum(xf * xf, axis=-1, keepdims=True)     # (tm, 1)
    ysq = jnp.sum(yf * yf, axis=-1)[None, :]           # (1, tn)
    inv = lax.rsqrt(jnp.maximum(xsq, eps2)) * lax.rsqrt(jnp.maximum(ysq, eps2))
    o_ref[...] = (dots * inv * inv_temp).astype(o_ref.dtype)


def _pairwise_ktiled_kernel(x_ref, y_ref, xsq_ref, ysq_ref, o_ref, *, inv_temp, eps2, precision):
    # Fallback for very large H: accumulate straight into the k-resident f32 output block
    # (no extra VMEM scratch, no epilogue copy).
    k = pl.program_id(2)

    @pl.when(k == 0)
    def _():
        o_ref[...] = jnp.zeros_like(o_ref)

    o_ref[...] += lax.dot_general(x_ref[...], y_ref[...], (((1,), (1,)), ((), ())),
                                  preferred_element_type=jnp.float32,
                                  precision=precision)

    @pl.when(k == pl.num_programs(2) - 1)
    def _():
        inv = (lax.rsqrt(jnp.maximum(xsq_ref[...], eps2)) *
               lax.rsqrt(jnp.maximum(ysq_ref[...], eps2)))
        o_ref[...] = o_ref[...] * inv * inv_temp


def _pairwise_cosine(x2d, y2d, temp, eps, out_dtype):
    Bx, H = x2d.shape
    By, H2 = y2d.shape
    assert H == H2
    inv_temp = 1.0 / float(temp)
    eps2 = float(eps) * float(eps)

    compute_dtype = out_dtype if jnp.issubdtype(out_dtype, jnp.floating) else jnp.float32
    x2d = x2d.astype(compute_dtype)
    y2d = y2d.astype(compute_dtype)
    # Explicit MXU precision: full-f32 passes for f32 operands (parity with an f32 reference);
    # bf16 operands already run at the full MXU rate with the default precision.
    precision = lax.Precision.HIGHEST if compute_dtype == jnp.float32 else None
    isz = jnp.dtype(compute_dtype).itemsize

    # Alignment-only padding: <=7 rows (sublane), <=127 cols (lane), <=127 features.
    Mp = _round_up(Bx, 8)
    Np = _round_up(By, 128)
    Kp = _round_up(H, 128)

    tm = _pick_mn_tile(Mp, 8, 512)
    tn = _pick_mn_tile(Np, 128, 512)

    def fullk_bytes(tm_, tn_):
        # double-buffered input strips + double-buffered output tile
        return 2 * (tm_ + tn_) * Kp * isz + 2 * tm_ * tn_ * 4

    use_fullk = fullk_bytes(tm, tn) <= _TILE_BUDGET
    if not use_fullk:
        tm = min(tm, 128 if Mp >= 128 else Mp)
        tn = min(tn, 128)
        use_fullk = fullk_bytes(tm, tn) <= _TILE_BUDGET

    Mp2 = _round_up(Mp, tm)
    Np2 = _round_up(Np, tn)

    # v7x has 2 TensorCores: make sure a 'parallel' grid axis has >=2 blocks when there is
    # enough work to split (megacore sharding only applies to parallel axes).
    if (Mp2 // tm) * (Np2 // tn) == 1:
        if Np2 >= 256:
            tn = 128 * _largest_divisor_leq(Np2 // 128, (Np2 // 128) // 2)
            Np2 = _round_up(Np, tn)
        elif Mp2 >= 16:
            tm = 8 * _largest_divisor_leq(Mp2 // 8, (Mp2 // 8) // 2)
            Mp2 = _round_up(Mp, tm)

    xp = x2d if (Mp2 == Bx and Kp == H) else jnp.pad(x2d, ((0, Mp2 - Bx), (0, Kp - H)))
    yp = y2d if (Np2 == By and Kp == H) else jnp.pad(y2d, ((0, Np2 - By), (0, Kp - H)))

    if use_fullk:
        out = pl.pallas_call(
            functools.partial(_pairwise_fullk_kernel, inv_temp=inv_temp, eps2=eps2,
                              precision=precision),
            out_shape=jax.ShapeDtypeStruct((Mp2, Np2), out_dtype),
            grid=(Mp2 // tm, Np2 // tn),
            in_specs=[
                # x block index (i, 0) is j-invariant: the x strip is DMA'd once per i
                # and reused across the whole j sweep.
                pl.BlockSpec((tm, Kp), lambda i, j: (i, 0)),
                pl.BlockSpec((tn, Kp), lambda i, j: (j, 0)),
            ],
            out_specs=pl.BlockSpec((tm, tn), lambda i, j: (i, j)),
            compiler_params=pltpu.CompilerParams(
                dimension_semantics=("parallel", "parallel"),
                vmem_limit_bytes=_VMEM_LIMIT),
        )(xp, yp)
        return out[:Bx, :By]

    # --- k-tiled fallback (very large H) ---
    # tk: multiple-of-128 divisor of Kp (no K padding beyond the 128 alignment).
    tk = 128 * _largest_divisor_leq(
        Kp // 128, max(1, (_TILE_BUDGET // (2 * (tm + tn) * isz)) // 128))
    # Row norms computed once from the UN-padded operands (padded rows/features would be zero).
    xsq = jnp.sum(jnp.square(x2d.astype(jnp.float32)), axis=-1, keepdims=True)  # (Bx, 1)
    ysq = jnp.sum(jnp.square(y2d.astype(jnp.float32)), axis=-1)[None, :]        # (1, By)
    xsq = jnp.pad(xsq, ((0, Mp2 - Bx), (0, 0)))
    ysq = jnp.pad(ysq, ((0, 0), (0, Np2 - By)))

    out = pl.pallas_call(
        functools.partial(_pairwise_ktiled_kernel, inv_temp=inv_temp, eps2=eps2,
                          precision=precision),
        out_shape=jax.ShapeDtypeStruct((Mp2, Np2), jnp.float32),
        grid=(Mp2 // tm, Np2 // tn, Kp // tk),
        in_specs=[
            pl.BlockSpec((tm, tk), lambda i, j, k: (i, k)),
            pl.BlockSpec((tn, tk), lambda i, j, k: (j, k)),
            pl.BlockSpec((tm, 1), lambda i, j, k: (i, 0)),
            pl.BlockSpec((1, tn), lambda i, j, k: (0, j)),
        ],
        out_specs=pl.BlockSpec((tm, tn), lambda i, j, k: (i, j)),
        compiler_params=pltpu.CompilerParams(
            dimension_semantics=("parallel", "parallel", "arbitrary"),
            vmem_limit_bytes=_VMEM_LIMIT),
    )(xp, yp, xsq, ysq)
    return out[:Bx, :By].astype(out_dtype)


# -----------------------------------------------------------------------------------------
# Row-reduction path: cos(x[n], y[n]) / temp for matching (N, H) rows.
# -----------------------------------------------------------------------------------------
def _rows_cos_kernel(x_ref, y_ref, o_ref, *, inv_temp, eps2):
    x = x_ref[...].astype(jnp.float32)
    y = y_ref[...].astype(jnp.float32)
    dot = jnp.sum(x * y, axis=-1)          # (tn,)
    xx = jnp.sum(x * x, axis=-1)
    yy = jnp.sum(y * y, axis=-1)
    inv = lax.rsqrt(jnp.maximum(xx, eps2)) * lax.rsqrt(jnp.maximum(yy, eps2))
    # Lane-dense store: output block is (1, tn), so no masked (tn, 1) partial stores.
    o_ref[...] = (dot * inv * inv_temp)[None, :].astype(o_ref.dtype)


def _rows_cosine(x2d, y2d, temp, eps, out_dtype):
    N, H = x2d.shape
    inv_temp = 1.0 / float(temp)
    eps2 = float(eps) * float(eps)
    isz = max(x2d.dtype.itemsize, y2d.dtype.itemsize)

    if N < 128:
        tn, Np = N, N                       # single full-extent block (allowed below (8,128))
    else:
        Np = _round_up(N, 128)              # pad by at most 127 rows
        m = Np // 128
        # ~4 MiB per input block; tn must divide Np so no extra padding is introduced.
        rows_budget = max(1, (4 * 1024 * 1024) // max(1, H * isz) // 128)
        d = _largest_divisor_leq(m, rows_budget)
        if d == m and m >= 2:               # give both v7x TensorCores at least one block
            d = _largest_divisor_leq(m, m // 2)
        tn = 128 * d
    if Np != N:
        x2d = jnp.pad(x2d, ((0, Np - N), (0, 0)))
        y2d = jnp.pad(y2d, ((0, Np - N), (0, 0)))

    out = pl.pallas_call(
        functools.partial(_rows_cos_kernel, inv_temp=inv_temp, eps2=eps2),
        out_shape=jax.ShapeDtypeStruct((1, Np), out_dtype),
        grid=(Np // tn,),
        in_specs=[
            pl.BlockSpec((tn, H), lambda i: (i, 0)),
            pl.BlockSpec((tn, H), lambda i: (i, 0)),
        ],
        out_specs=pl.BlockSpec((1, tn), lambda i: (0, i)),
        compiler_params=pltpu.CompilerParams(
            dimension_semantics=("parallel",),
            vmem_limit_bytes=_VMEM_LIMIT),
    )(x2d, y2d)
    return out[0, :N]


# -----------------------------------------------------------------------------------------
# Public wrapper: matches `Similarity.forward(x, y)` semantics (temp fixed at construction).
# -----------------------------------------------------------------------------------------
def similarity(x, y, temp, *, eps=_EPS):
    x = jnp.asarray(x)
    y = jnp.asarray(y)
    out_dtype = jnp.promote_types(x.dtype, y.dtype)
    if not jnp.issubdtype(out_dtype, jnp.floating):
        out_dtype = jnp.float32

    # SimCSE-style pairwise pattern: never materialize the (Bx, By, H) broadcast in HBM.
    if x.ndim == 3 and y.ndim == 3 and x.shape[-1] == y.shape[-1]:
        if x.shape[1] == 1 and y.shape[0] == 1:            # (Bx,1,H) x (1,By,H) -> (Bx,By)
            return _pairwise_cosine(x[:, 0, :], y[0, :, :], temp, eps, out_dtype)
        if x.shape[0] == 1 and y.shape[1] == 1:            # (1,A,H) x (B,1,H) -> (B,A)
            return _pairwise_cosine(y[:, 0, :], x[0, :, :], temp, eps, out_dtype)

    bshape = jnp.broadcast_shapes(x.shape, y.shape)
    H = bshape[-1]
    if x.shape == bshape and y.shape == bshape:
        xb = x.reshape(-1, H)
        yb = y.reshape(-1, H)
    else:
        # General-broadcast fallback (rare for this module); materializes the broadcast.
        xb = jnp.broadcast_to(x, bshape).reshape(-1, H)
        yb = jnp.broadcast_to(y, bshape).reshape(-1, H)
    out = _rows_cosine(xb, yb, temp, eps, out_dtype)
    return out.reshape(bshape[:-1])


def _reference(x, y, temp, eps=_EPS):
    dot = jnp.sum(x * y, axis=-1)
    nx = jnp.maximum(jnp.linalg.norm(x, axis=-1), eps)
    ny = jnp.maximum(jnp.linalg.norm(y, axis=-1), eps)
    return dot / (nx * ny) / temp


if __name__ == "__main__":
    key = jax.random.PRNGKey(0)
    kx, ky, ka, kb = jax.random.split(key, 4)
    temp = 0.05

    # 1) SimCSE-style pairwise: (B,1,H) x (1,B,H) -> (B,B)  [full-K MXU path]
    B, H = 8, 32
    x = jax.random.normal(kx, (B, 1, H), dtype=jnp.float32)
    y = jax.random.normal(ky, (1, B, H), dtype=jnp.float32)
    out = jax.block_until_ready(similarity(x, y, temp))
    ref = _reference(x, y, temp)
    assert out.shape == (B, B), out.shape
    assert jnp.allclose(out, ref, atol=1e-4, rtol=1e-4), float(jnp.max(jnp.abs(out - ref)))

    # 2) Same-shape elementwise: (2,8,H) x (2,8,H) -> (2,8)  [row-reduction path]
    a = jax.random.normal(ka, (2, 8, H), dtype=jnp.float32)
    b = jax.random.normal(kb, (2, 8, H), dtype=jnp.float32)
    out2 = jax.block_until_ready(similarity(a, b, temp))
    ref2 = _reference(a, b, temp)
    assert out2.shape == (2, 8), out2.shape
    assert jnp.allclose(out2, ref2, atol=1e-4, rtol=1e-4), float(jnp.max(jnp.abs(out2 - ref2)))

    print("KERNEL_OK")
</pallas_src>

<mosaic_0001>
module attributes {stable_mosaic.version = 11 : i64} {
  func.func @_pairwise_fullk_kernel(%arg0: i32, %arg1: i32, %arg2: memref<8x128xf32, #tpu.memory_space<vmem>>, %arg3: memref<128x128xf32, #tpu.memory_space<vmem>>, %arg4: memref<8x128xf32, #tpu.memory_space<vmem>>) attributes {dimension_semantics = [#tpu.dimension_semantics<parallel>, #tpu.dimension_semantics<parallel>], iteration_bounds = array<i64: 1, 1>, scalar_prefetch = 0 : i64, scratch_operands = 0 : i64, tpu.core_type = #tpu.core_type<tc>, window_params = [{transform_indices = @transform_0, window_bounds = array<i64: 8, 128>}, {transform_indices = @transform_1, window_bounds = array<i64: 128, 128>}, {transform_indices = @transform_2, window_bounds = array<i64: 8, 128>}]} {
    %c0 = arith.constant 0 : index
    %c0_0 = arith.constant 0 : index
    %0 = vector.load %arg2[%c0, %c0_0] : memref<8x128xf32, #tpu.memory_space<vmem>>, vector<8x128xf32>
    %c0_1 = arith.constant 0 : index
    %c0_2 = arith.constant 0 : index
    %1 = vector.load %arg3[%c0_1, %c0_2] : memref<128x128xf32, #tpu.memory_space<vmem>>, vector<128x128xf32>
    %cst = arith.constant dense<0.000000e+00> : vector<8x128xf32>
    %2 = tpu.matmul %0, %1, %cst {dimension_numbers = #tpu.dot_dimension_numbers<[1], [1], [0], [0], [0, 0, 1, 0], [], []>, precision = #tpu.contract_precision<fp32>} : vector<8x128xf32>, vector<128x128xf32>, vector<8x128xf32> -> vector<8x128xf32>
    %3 = arith.mulf %0, %0 : vector<8x128xf32>
    %cst_3 = arith.constant dense<0.000000e+00> : vector<8xf32>
    %4 = vector.multi_reduction <add>, %3, %cst_3 [1] : vector<8x128xf32> to vector<8xf32>
    %5 = vector.shape_cast %4 : vector<8xf32> to vector<8x1xf32>
    %6 = arith.mulf %1, %1 : vector<128x128xf32>
    %cst_4 = arith.constant dense<0.000000e+00> : vector<128xf32>
    %7 = vector.multi_reduction <add>, %6, %cst_4 [1] : vector<128x128xf32> to vector<128xf32>
    %8 = vector.shape_cast %7 : vector<128xf32> to vector<1x128xf32>
    %cst_5 = arith.constant 1.000000e-16 : f32
    %9 = vector.broadcast %cst_5 : f32 to vector<8x1xf32>
    %10 = arith.maximumf %5, %9 : vector<8x1xf32>
    %11 = math.rsqrt %10 : vector<8x1xf32>
    %cst_6 = arith.constant 1.000000e-16 : f32
    %12 = vector.broadcast %cst_6 : f32 to vector<1x128xf32>
    %13 = arith.maximumf %8, %12 : vector<1x128xf32>
    %14 = math.rsqrt %13 : vector<1x128xf32>
    %15 = vector.broadcast %11 : vector<8x1xf32> to vector<8x128xf32>
    %16 = vector.broadcast %14 : vector<1x128xf32> to vector<8x128xf32>
    %17 = arith.mulf %15, %16 : vector<8x128xf32>
    %18 = arith.mulf %2, %17 : vector<8x128xf32>
    %cst_7 = arith.constant 2.000000e+01 : f32
    %19 = vector.broadcast %cst_7 : f32 to vector<8x128xf32>
    %20 = arith.mulf %18, %19 : vector<8x128xf32>
    %c0_8 = arith.constant 0 : index
    %c0_9 = arith.constant 0 : index
    %21 = vector.load %arg4[%c0_8, %c0_9] : memref<8x128xf32, #tpu.memory_space<vmem>>, vector<8x128xf32>
    tpu.vector_store %arg4[%c0_8, %c0_9], %20 {strides = array<i32>} : memref<8x128xf32, #tpu.memory_space<vmem>>, vector<8x128xf32>,
    return
  }
  func.func @transform_0(%arg0: i32, %arg1: i32) -> (i32, i32) {
    %c0_i32 = arith.constant 0 : i32
    %c0_i32_0 = arith.constant 0 : i32
    return %arg0, %c0_i32 : i32, i32
  }
  func.func @transform_1(%arg0: i32, %arg1: i32) -> (i32, i32) {
    %c0_i32 = arith.constant 0 : i32
    %c0_i32_0 = arith.constant 0 : i32
    return %arg1, %c0_i32 : i32, i32
  }
  func.func @transform_2(%arg0: i32, %arg1: i32) -> (i32, i32) {
    %c0_i32 = arith.constant 0 : i32
    return %arg0, %arg1 : i32, i32
  }
}

</mosaic_0001>

<bundles_post_ra>
// kernel: tpu_custom_call.1
= control target key start
LH: loop header
LB: loop body
LE: loop exit
PB: predicated region body
PF: predicated region fallthrough
CT: control target
= control target key end

     0   :  { %7 = vsyncpa [#allocation3], 0  ;;  %s1550_s0 = inlined_call_operand.hbm [shape: f32[8,128], index: 0, kind: input, shape index: {}]   ;;  %s1551_s1 = inlined_call_operand.hbm [shape: f32[128,128], index: 1, kind: input, shape index: {}]   ;;  %s1552_s2 = inlined_call_operand.hbm [shape: f32[8,128], index: 2, kind: output, shape index: {}]  }
   0x1   :  { %8 = vsyncpa [#allocation6], 0 }
   0x2   :  { %9 = vsyncpa [#allocation4], 0  ;;  %s15_s11 = sshll.u32 %s1550_s0, 4  ;;  %s869_s12 = smov [#allocation2]   ;;  %s16_s11 = int_to_ptr.hbm [resolvable:$true] %s15_s11 }
   0x3   :  { %s17_s13 = sshll.u32 %s869_s12, 4  ;;  %s25_s16 = sshll.u32 %s1551_s1, 4  ;;  %s18_s13 = int_to_ptr.vmem [resolvable:$true] %s17_s13  ;;  %s26_s16 = int_to_ptr.hbm [resolvable:$true] %s25_s16 }
   0x4   :  { %20 = dma.hbm_to_vmem [thread:$0]  %s16_s11, 128, %s18_s13, [#allocation3]  }
   0x5   :  { %s870_s17 = smov [#allocation5]   ;;  %s871_s19 = smov 128  }
   0x6   :  { %s27_s18 = sshll.u32 %s870_s17, 4  ;;  %s872_s20 = smov 8   ;;  %s28_s18 = int_to_ptr.vmem [resolvable:$true] %s27_s18 }
   0x7   :  { %33 = dma.hbm_to_vmem [thread:$0]  %s26_s16, 2048, %s28_s18, [#allocation6], %s871_s19, %s871_s19, %s872_s20  }
   0x8   :  { %863 = dma.done.wait [#allocation3], 128  }
   0x9   :  { %864 = vsyncadd [#allocation3], 4294967168 }
   0xa   :  { %865 = dma.done.wait [#allocation6], 2048  }
   0xb   :  { %866 = vsyncadd [#allocation6], 4294965248  ;;  %v895_v0 = vld [vmem:[#allocation5 + $0x78] sm:$0xff]  ;;  %v897_v1 = vld [vmem:[#allocation5 + $0x70] sm:$0xff]  ;;  %vm659_vm7 = vcmask 130112   ;;  %vm663_vm10 = vcmask 195712  }
   0xc   :  { %v899_v2 = vld [vmem:[#allocation5 + $0x68] sm:$0xff]  ;;  %v902_v3 = vand.u32 4294901760, %v895_v0  ;;  %v905_v4 = vand.u32 4294901760, %v897_v1  ;;  %v910_v6 = vld [vmem:[#allocation5 + $0x60] sm:$0xff]  ;;  %v928_v11 = vld [vmem:[#allocation5 + $0x58] sm:$0xff]  ;;  %vm667_vm15 = vcmask 261312  }
   0xd   :  { %v908_v5 = vand.u32 4294901760, %v899_v2  ;;  %v922_v9 = vand.u32 4294901760, %v910_v6  ;;  %v935_v14 = vand.u32 4294901760, %v928_v11  ;;  %v949_v19 = vld [vmem:[#allocation5 + $0x50] sm:$0xff]  ;;  %v952_v20 = vld [vmem:[#allocation5] sm:$0xff]  ;;  %v969_v28 = vld [vmem:[#allocation5 + $0x48] sm:$0xff] }
   0xe   :  { %60 = vmatpush.xpose.msra.mxu0 %v902_v3  ;;  %v915_v7 = vsub.f32 %v895_v0, %v902_v3  ;;  %v919_v8 = vsub.f32 %v897_v1, %v905_v4  ;;  %256 = vmatpush.xpose.msra.mxu3 %v902_v3  ;;  %v954_v22 = vld [vmem:[#allocation5 + $0x10] sm:$0xff]  ;;  %v958_v23 = vand.u32 4294901760, %v949_v19  ;;  %v403_v29 = vmul.f32 %v952_v20, %v952_v20  ;;  %v975_v31 = vld [vmem:[#allocation5 + $0x20] sm:$0xff]  ;;  %v984_v34 = vld [vmem:[#allocation5 + $0x8] sm:$0xff]  ;;  %s873_s0 = smov [#allocation7]   ;;  %s741_s23 = sshll.u32 %s1552_s2, 4  ;;  %s742_s23 = int_to_ptr.hbm [resolvable:$true] %s741_s23 }
   0xf   :  { %v926_v10 = vsub.f32 %v899_v2, %v908_v5  ;;  %v947_v18 = vsub.f32 %v910_v6, %v922_v9  ;;  %v962_v24 = vsub.f32 %v928_v11, %v935_v14  ;;  %v405_v30 = vmul.f32 %v954_v22, %v954_v22  ;;  %v51_v39 = vld [vmem:[#allocation5 + $0x40] sm:$0xff]  ;;  %v995_v40 = vld [vmem:[#allocation5 + $0x18] sm:$0xff]  ;;  %v48_v49 = vld [vmem:[#allocation5 + $0x28] sm:$0xff]  ;;  %s739_s1 = sshll.u32 %s873_s0, 4  ;;  %s740_s1 = int_to_ptr.vmem [resolvable:$true] %s739_s1 }
  0x10   :  { %v102_v12 = vand.u32 4294901760, %v915_v7  ;;  %v108_v13 = vand.u32 4294901760, %v919_v8  ;;  %203 = vmatpush.xpose.msra.mxu2 %v915_v7  ;;  %419 = vadd.xlane.f32.xlu0 %v403_v29  ;;  %v980_v32 = vand.u32 4294901760, %v969_v28  ;;  %v407_v33 = vmul.f32 %v975_v31, %v975_v31  ;;  %v50_v48 = vld [vmem:[#allocation5 + $0x38] sm:$0xff]  ;;  %v49_v56 = vld [vmem:[#allocation5 + $0x30] sm:$0xff] }
  0x11   :  { %v114_v17 = vand.u32 4294901760, %v926_v10  ;;  %v120_v27 = vand.u32 4294901760, %v947_v18  ;;  %423 = vadd.xlane.f32.xlu1 %v405_v30  ;;  %v126_v37 = vand.u32 4294901760, %v962_v24  ;;  %v993_v38 = vsub.f32 %v949_v19, %v958_v23 }
  0x12   :  { %62 = vmatpush.xpose.msra.mxu0 %v905_v4  ;;  %v103_v15 = vsub.f32 %v915_v7, %v102_v12  ;;  %v109_v16 = vsub.f32 %v919_v8, %v108_v13  ;;  %258 = vmatpush.xpose.msra.mxu3 %v905_v4  ;;  %v404_v41 = vmul.f32 %v984_v34, %v984_v34  ;;  %v1012_v47 = vand.u32 4294901760, %v51_v39 }
  0x13   :  { %v115_v26 = vsub.f32 %v926_v10, %v114_v17  ;;  %v121_v36 = vsub.f32 %v947_v18, %v120_v27  ;;  %427 = vadd.xlane.f32.xlu2 %v407_v33  ;;  %v1003_v42 = vsub.f32 %v969_v28, %v980_v32  ;;  %v406_v43 = vmul.f32 %v995_v40, %v995_v40 }
  0x14   :  { %v104_v21 = vand.u32 4294901760, %v103_v15  ;;  %206 = vmatpush.xpose.msra.mxu2 %v919_v8  ;;  %v110_v25 = vand.u32 4294901760, %v109_v16  ;;  %v127_v45 = vsub.f32 %v962_v24, %v126_v37  ;;  %v132_v46 = vand.u32 4294901760, %v993_v38 }
  0x15   :  { %v116_v35 = vand.u32 4294901760, %v115_v26  ;;  %v122_v44 = vand.u32 4294901760, %v121_v36  ;;  %v138_v50 = vand.u32 4294901760, %v1003_v42  ;;  %v408_v51 = vmul.f32 %v48_v49, %v48_v49 }
  0x16   :  { %105 = vmatpush.xpose.msra.mxu1 %v104_v21  ;;  %64 = vmatpush.xpose.msra.mxu0 %v908_v5  ;;  %v128_v52 = vand.u32 4294901760, %v127_v45  ;;  %v133_v53 = vsub.f32 %v993_v38, %v132_v46  ;;  %v1021_v54 = vand.u32 4294901760, %v50_v48  ;;  %v1024_v55 = vsub.f32 %v51_v39, %v1012_v47 }
  0x17   :  { %260 = vmatpush.xpose.msra.mxu3 %v908_v5  ;;  %v409_v57 = vmul.f32 %v49_v56, %v49_v56  ;;  %v139_v58 = vsub.f32 %v1003_v42, %v138_v50  ;;  %v410_v59 = vmul.f32 %v50_v48, %v50_v48  ;;  %v1033_v62 = vand.u32 4294901760, %v49_v56 }
  0x18   :  { %209 = vmatpush.xpose.msra.mxu2 %v926_v10  ;;  %421 = vadd.xlane.f32.xlu0 %v404_v41  ;;  %v134_v60 = vand.u32 4294901760, %v133_v53  ;;  %v144_v61 = vand.u32 4294901760, %v1024_v55  ;;  %v1036_v63 = vsub.f32 %v50_v48, %v1021_v54  ;;  %v411_v16 = vmul.f32 %v51_v39, %v51_v39 }
  0x19   :  { %425 = vadd.xlane.f32.xlu1 %v406_v43  ;;  %v140_v15 = vand.u32 4294901760, %v139_v58  ;;  %v1045_v26 = vand.u32 4294901760, %v48_v49  ;;  %v1048_v29 = vsub.f32 %v49_v56, %v1033_v62  ;;  %v412_v30 = vmul.f32 %v969_v28, %v969_v28 }
  0x1a   :  { %111 = vmatpush.xpose.msra.mxu1 %v110_v25  ;;  %66 = vmatpush.xpose.msra.mxu0 %v922_v9  ;;  %v145_v21 = vsub.f32 %v1024_v55, %v144_v61  ;;  %v150_v25 = vand.u32 4294901760, %v1036_v63  ;;  %v1055_v33 = vand.u32 4294901760, %v975_v31  ;;  %v414_v43 = vmul.f32 %v928_v11, %v928_v11 }
  0x1b   :  { %262 = vmatpush.xpose.msra.mxu3 %v922_v9  ;;  %429 = vadd.xlane.f32.xlu2 %v408_v51  ;;  %v156_v41 = vand.u32 4294901760, %v1048_v29  ;;  %v1065_v28 = vsub.f32 %v48_v49, %v1045_v26  ;;  %v1081_v49 = vand.u32 4294901760, %v995_v40  ;;  %v1088_v11 = vand.u32 4294901760, %v954_v22 }
  0x1c   :  { %212 = vmatpush.xpose.msra.mxu2 %v947_v18  ;;  %v146_v36 = vand.u32 4294901760, %v145_v21  ;;  %v151_v39 = vsub.f32 %v1036_v63, %v150_v25  ;;  %v416_v51 = vmul.f32 %v899_v2, %v899_v2  ;;  %v1110_v58 = vand.u32 4294901760, %v984_v34 }
  0x1d   :  { %v157_v45 = vsub.f32 %v1048_v29, %v156_v41  ;;  %v162_v48 = vand.u32 4294901760, %v1065_v28  ;;  %v1098_v56 = vsub.f32 %v995_v40, %v1081_v49  ;;  %v1107_v2 = vsub.f32 %v954_v22, %v1088_v11 }
  0x1e   :  { %117 = vmatpush.xpose.msra.mxu1 %v116_v35  ;;  %68 = vmatpush.xpose.msra.mxu0 %v935_v14  ;;  %v413_v35 = vmul.f32 %v949_v19, %v949_v19  ;;  %v1071_v19 = vsub.f32 %v975_v31, %v1055_v33  ;;  %v415_v31 = vmul.f32 %v910_v6, %v910_v6 }
  0x1f   :  { %264 = vmatpush.xpose.msra.mxu3 %v935_v14  ;;  %v163_v53 = vsub.f32 %v1065_v28, %v162_v48  ;;  %v418_v22 = vmul.f32 %v895_v0, %v895_v0  ;;  %v1126_v21 = vsub.f32 %v984_v34, %v1110_v58  ;;  %v180_v0 = vand.u32 4294901760, %v1107_v2 }
  0x20   :  { %215 = vmatpush.xpose.msra.mxu2 %v962_v24  ;;  %431 = vadd.xlane.f32.xlu0 %v409_v57  ;;  %v168_v6 = vand.u32 4294901760, %v1071_v19  ;;  %v417_v57 = vmul.f32 %v897_v1, %v897_v1 }
  0x21   :  { %433 = vadd.xlane.f32.xlu1 %v410_v59  ;;  %v164_v40 = vand.u32 4294901760, %v163_v53  ;;  %v174_v59 = vand.u32 4294901760, %v1098_v56 }
  0x22   :  { %123 = vmatpush.xpose.msra.mxu1 %v122_v44  ;;  %70 = vmatpush.xpose.msra.mxu0 %v958_v23  ;;  %v152_v44 = vand.u32 4294901760, %v151_v39  ;;  %v169_v1 = vsub.f32 %v1071_v19, %v168_v6  ;;  %v181_v39 = vsub.f32 %v1107_v2, %v180_v0 }
  0x23   :  { %266 = vmatpush.xpose.msra.mxu3 %v958_v23  ;;  %435 = vadd.xlane.f32.xlu2 %v411_v16 }
  0x24   :  { %218 = vmatpush.xpose.msra.mxu2 %v993_v38 }
  0x26   :  { %129 = vmatpush.xpose.msra.mxu1 %v128_v52  ;;  %72 = vmatpush.xpose.msra.mxu0 %v980_v32  ;;  %v158_v52 = vand.u32 4294901760, %v157_v45 }
  0x27   :  { %268 = vmatpush.xpose.msra.mxu3 %v980_v32 }
  0x28   :  { %221 = vmatpush.xpose.msra.mxu2 %v1003_v42  ;;  %437 = vadd.xlane.f32.xlu0 %v412_v30  ;;  %v170_v30 = vand.u32 4294901760, %v169_v1 }
  0x29   :  { %439 = vadd.xlane.f32.xlu1 %v413_v35  ;;  %v175_v35 = vsub.f32 %v1098_v56, %v174_v59 }
  0x2a   :  { %135 = vmatpush.xpose.msra.mxu1 %v134_v60  ;;  %74 = vmatpush.xpose.msra.mxu0 %v1012_v47  ;;  %v42_v60 = vld [vmem:[#allocation2] sm:$0xff] }
  0x2b   :  { %270 = vmatpush.xpose.msra.mxu3 %v1012_v47  ;;  %441 = vadd.xlane.f32.xlu2 %v414_v43  ;;  %v400_v16 = vmul.f32 %v42_v60, %v42_v60  ;;  %v186_v43 = vand.u32 4294901760, %v1126_v21  ;;  %v91_v53 = vand.u32 4294901760, %v42_v60 }
  0x2c   :  { %224 = vmatpush.xpose.msra.mxu2 %v1024_v55 }
  0x2d   :  { %v187_v45 = vsub.f32 %v1126_v21, %v186_v43  ;;  %v92_v7 = vsub.f32 %v42_v60, %v91_v53 }
  0x2e   :  { %141 = vmatpush.xpose.msra.mxu1 %v140_v15  ;;  %76 = vmatpush.xpose.msra.mxu0 %v1021_v54  ;;  %v1122_v15 = vand.u32 4294901760, %v952_v20 }
  0x2f   :  { %272 = vmatpush.xpose.msra.mxu3 %v1021_v54 }
  0x30   :  { %227 = vmatpush.xpose.msra.mxu2 %v1036_v63  ;;  %443 = vadd.xlane.f32.xlu0 %v415_v31  ;;  %v191_v34 = vsub.f32 %v952_v20, %v1122_v15  ;;  %v188_v20 = vand.u32 4294901760, %v187_v45 }
  0x31   :  { %445 = vadd.xlane.f32.xlu1 %v416_v51 }
  0x32   :  { %147 = vmatpush.xpose.msra.mxu1 %v146_v36  ;;  %78 = vmatpush.xpose.msra.mxu0 %v1033_v62  ;;  %v176_v36 = vand.u32 4294901760, %v175_v35  ;;  %v192_v31 = vand.u32 4294901760, %v191_v34 }
  0x33   :  { %274 = vmatpush.xpose.msra.mxu3 %v1033_v62  ;;  %447 = vadd.xlane.f32.xlu2 %v417_v57 }
  0x34   :  { %230 = vmatpush.xpose.msra.mxu2 %v1048_v29  ;;  %v193_v51 = vsub.f32 %v191_v34, %v192_v31 }
  0x36   :  { %153 = vmatpush.xpose.msra.mxu1 %v152_v44  ;;  %80 = vmatpush.xpose.msra.mxu0 %v1045_v26  ;;  %v182_v44 = vand.u32 4294901760, %v181_v39 }
  0x37   :  { %276 = vmatpush.xpose.msra.mxu3 %v1045_v26 }
  0x38   :  { %233 = vmatpush.xpose.msra.mxu2 %v1065_v28  ;;  %449 = vadd.xlane.f32.xlu0 %v418_v22 }
  0x39   :  { %401 = vadd.xlane.f32.xlu1 %v400_v16 }
  0x3a   :  { %159 = vmatpush.xpose.msra.mxu1 %v158_v52  ;;  %82 = vmatpush.xpose.msra.mxu0 %v1055_v33  ;;  %v194_v52 = vand.u32 4294901760, %v193_v51 }
  0x3b   :  { %278 = vmatpush.xpose.msra.mxu3 %v1055_v33 }
  0x3c   :  { %236 = vmatpush.xpose.msra.mxu2 %v1071_v19 }
  0x3e   :  { %165 = vmatpush.xpose.msra.mxu1 %v164_v40  ;;  %84 = vmatpush.xpose.msra.mxu0 %v1081_v49 }
  0x3f   :  { %280 = vmatpush.xpose.msra.mxu3 %v1081_v49 }
  0x40   :  { %239 = vmatpush.xpose.msra.mxu2 %v1098_v56 }
  0x42   :  { %171 = vmatpush.xpose.msra.mxu1 %v170_v30  ;;  %86 = vmatpush.xpose.msra.mxu0 %v1088_v11 }
  0x43   :  { %282 = vmatpush.xpose.msra.mxu3 %v1088_v11 }
  0x44   :  { %242 = vmatpush.xpose.msra.mxu2 %v1107_v2 }
  0x46   :  { %177 = vmatpush.xpose.msra.mxu1 %v176_v36  ;;  %88 = vmatpush.xpose.msra.mxu0 %v1110_v58 }
  0x47   :  { %284 = vmatpush.xpose.msra.mxu3 %v1110_v58 }
  0x48   :  { %245 = vmatpush.xpose.msra.mxu2 %v1126_v21 }
  0x4a   :  { %183 = vmatpush.xpose.msra.mxu1 %v182_v44  ;;  %90 = vmatpush.xpose.msra.mxu0 %v1122_v15 }
  0x4b   :  { %286 = vmatpush.xpose.msra.mxu3 %v1122_v15 }
  0x4c   :  { %248 = vmatpush.xpose.msra.mxu2 %v191_v34 }
  0x4e   :  { %297 = vmatpush.xpose.msrb.mxu0 %v102_v12  ;;  %189 = vmatpush.xpose.msra.mxu1 %v188_v20 }
  0x4f   :  { %251 = vmatmul.f32.vlgmr.msra.gmra.mxu2 %v92_v7 }
  0x52   :  { %301 = vmatpush.xpose.msrb.mxu0 %v108_v13  ;;  %195 = vmatpush.xpose.msra.mxu1 %v194_v52 }
  0x55   :  { %197 = vmatmul.f32.vlgmr.msra.gmra.mxu1 %v91_v53 }
  0x56   :  { %364 = vmatpush.xpose.msrb.mxu1 %v902_v3  ;;  %305 = vmatpush.xpose.msrb.mxu0 %v114_v17  ;;  %v93_v3 = vand.u32 4294901760, %v92_v7 }
  0x58   :  { %v94_v8 = vsub.f32 %v92_v7, %v93_v3  ;;  %290 = vmatmul.f32.vlgmr.msra.gmra.mxu3 %v93_v3 }
  0x5a   :  { %366 = vmatpush.xpose.msrb.mxu1 %v905_v4  ;;  %309 = vmatpush.xpose.msrb.mxu0 %v120_v27  ;;  %v95_v4 = vand.u32 4294901760, %v94_v8 }
  0x5c   :  { %96 = vmatmul.f32.vlgmr.msra.gmra.mxu0 %v95_v4 }
  0x5e   :  { %368 = vmatpush.xpose.msrb.mxu1 %v908_v5  ;;  %313 = vmatpush.xpose.msrb.mxu0 %v126_v37 }
  0x62   :  { %370 = vmatpush.xpose.msrb.mxu1 %v922_v9  ;;  %317 = vmatpush.xpose.msrb.mxu0 %v132_v46 }
  0x66   :  { %372 = vmatpush.xpose.msrb.mxu1 %v935_v14  ;;  %321 = vmatpush.xpose.msrb.mxu0 %v138_v50 }
  0x6a   :  { %374 = vmatpush.xpose.msrb.mxu1 %v958_v23  ;;  %325 = vmatpush.xpose.msrb.mxu0 %v144_v61 }
  0x6e   :  { %376 = vmatpush.xpose.msrb.mxu1 %v980_v32  ;;  %329 = vmatpush.xpose.msrb.mxu0 %v150_v25 }
  0x72   :  { %378 = vmatpush.xpose.msrb.mxu1 %v1012_v47  ;;  %333 = vmatpush.xpose.msrb.mxu0 %v156_v41 }
  0x76   :  { %380 = vmatpush.xpose.msrb.mxu1 %v1021_v54  ;;  %337 = vmatpush.xpose.msrb.mxu0 %v162_v48 }
  0x7a   :  { %382 = vmatpush.xpose.msrb.mxu1 %v1033_v62  ;;  %341 = vmatpush.xpose.msrb.mxu0 %v168_v6 }
  0x7e   :  { %384 = vmatpush.xpose.msrb.mxu1 %v1045_v26  ;;  %345 = vmatpush.xpose.msrb.mxu0 %v174_v59 }
  0x82   :  { %386 = vmatpush.xpose.msrb.mxu1 %v1055_v33  ;;  %349 = vmatpush.xpose.msrb.mxu0 %v180_v0  ;;  %v654_v33 = vlaneseq }
  0x83   :  { %v420_v5 = vpop.xlane.xlu0 %419 }
  0x84   :  { %v424_v9 = vpop.xlane.xlu1 %423  ;;  %v1190_v12 = vmax.f32 %v420_v5, 1e-16  ;;  %v1240_v2 = vand.u32 127, %v654_v33 }
  0x85   :  { %v1194_v17 = vmax.f32 %v424_v9, 1e-16 }
  0x86   :  { %388 = vmatpush.xpose.msrb.mxu1 %v1081_v49  ;;  %353 = vmatpush.xpose.msrb.mxu0 %v186_v43  ;;  %v428_v10 = vpop.xlane.xlu2 %427  ;;  %757 = vrsqrt.f32 %v1190_v12  ;;  %vm484_vm0 = vweird.f32 %v1190_v12  ;;  %v661_v30 = vadd.s32 4294967280, %v1240_v2  ;;  %v657_v7 = vadd.s32 4294967288, %v1240_v2 }
  0x87   :  { %v1201_v27 = vmax.f32 %v428_v10, 1e-16  ;;  %vm504_vm4 = vweird.f32 %v1194_v17 }
  0x89   :  { %vm524_vm13 = vweird.f32 %v1201_v27 }
  0x8a   :  { %390 = vmatpush.xpose.msrb.mxu1 %v1088_v11  ;;  %357 = vmatpush.xpose.msrb.mxu0 %v192_v31 }
  0x8b   :  { %v422_v13 = vpop.xlane.xlu0 %421 }
  0x8c   :  { %v1192_v14 = vmax.f32 %v422_v13, 1e-16  ;;  %v426_v18 = vpop.xlane.xlu1 %425  ;;  %v1203_v32 = vpop.eup %757 }
  0x8d   :  { %359 = vmatmul.f32.vlgmr.msrb.gmra.mxu0 %v91_v53  ;;  %v1199_v23 = vmax.f32 %v426_v18, 1e-16  ;;  %v479_v47 = vmul.f32 %v1203_v32, %v1190_v12  ;;  %vm485_vm1 = vweird.f32 %v1203_v32 }
  0x8e   :  { %392 = vmatpush.xpose.msrb.mxu1 %v1110_v58  ;;  %759 = vrsqrt.f32 %v1192_v14  ;;  %v430_v24 = vpop.xlane.xlu2 %429  ;;  %vm494_vm2 = vweird.f32 %v1192_v14  ;;  %vm1268_vm5 = vmor %vm484_vm0, %vm485_vm1 }
  0x8f   :  { %761 = vrsqrt.f32 %v1194_v17  ;;  %v1211_v46 = vmax.f32 %v430_v24, 1e-16  ;;  %v480_v26 = vmul.f32 %v1203_v32, %v479_v47  ;;  %vm514_vm11 = vweird.f32 %v1199_v23 }
  0x90   :  { %763 = vrsqrt.f32 %v1199_v23 }
  0x91   :  { %765 = vrsqrt.f32 %v1201_v27  ;;  %v481_v11 = vmul.f32 0.5, %v480_v26 }
  0x92   :  { %394 = vmatpush.xpose.msrb.mxu1 %v1122_v15  ;;  %767 = vrsqrt.f32 %v1211_v46 }
  0x93   :  { %v432_v37 = vpop.xlane.xlu0 %431  ;;  %v482_v60 = vsub.f32 1.5, %v481_v11 }
  0x94   :  { %v1205_v38 = vpop.eup %759  ;;  %v1219_v55 = vmax.f32 %v432_v37, 1e-16  ;;  %v434_v61 = vpop.xlane.xlu1 %433 }
  0x95   :  { %396 = vmatmul.f32.vlgmr.msrb.gmra.mxu1 %v91_v53  ;;  %v1209_v42 = vpop.eup %761  ;;  %v489_v50 = vmul.f32 %v1205_v38, %v1192_v14  ;;  %v1228_v41 = vmax.f32 %v434_v61, 1e-16  ;;  %vm495_vm3 = vweird.f32 %v1205_v38  ;;  %v483_v45 = vmul.f32 %v1203_v32, %v482_v60 }
  0x96   :  { %v499_v54 = vmul.f32 %v1209_v42, %v1194_v17  ;;  %v1221_v62 = vpop.eup %763  ;;  %v436_v63 = vpop.xlane.xlu2 %435  ;;  %769 = vrsqrt.f32 %v1219_v55  ;;  %vm505_vm6 = vweird.f32 %v1209_v42  ;;  %v1276_v53 = vadd.s32 4294967264, %v1240_v2  ;;  %vm1283_vm8 = vmor %vm494_vm2, %vm495_vm3 }
  0x97   :  { %v1224_v25 = vpop.eup %765  ;;  %v490_v29 = vmul.f32 %v1205_v38, %v489_v50  ;;  %v509_v19 = vmul.f32 %v1221_v62, %v1199_v23  ;;  %v1236_v6 = vmax.f32 %v436_v63, 1e-16  ;;  %771 = vrsqrt.f32 %v1228_v41  ;;  %vm1297_vm9 = vmor %vm504_vm4, %vm505_vm6 }
  0x98   :  { %v500_v28 = vmul.f32 %v1209_v42, %v499_v54  ;;  %v519_v49 = vmul.f32 %v1224_v25, %v1201_v27  ;;  %v1238_v57 = vpop.eup %767  ;;  %vm515_vm12 = vweird.f32 %v1221_v62  ;;  %v487_v18 = vsel %vm1268_vm5, %v1203_v32, %v483_v45 }
  0x99   :  { %v491_v56 = vmul.f32 0.5, %v490_v29  ;;  %v510_v40 = vmul.f32 %v1221_v62, %v509_v19  ;;  %v529_v16 = vmul.f32 %v1238_v57, %v1211_v46  ;;  %773 = vrsqrt.f32 %v1236_v6  ;;  %vm1330_vm0 = vmor %vm514_vm11, %vm515_vm12 }
  0x9a   :  { %v501_v58 = vmul.f32 0.5, %v500_v28  ;;  %v520_v1 = vmul.f32 %v1224_v25, %v519_v49  ;;  %v665_v50 = vadd.s32 4294967272, %v1240_v2  ;;  %vm525_vm14 = vweird.f32 %v1224_v25 }
  0x9b   :  { %v438_v48 = vpop.xlane.xlu0 %437  ;;  %v492_v15 = vsub.f32 1.5, %v491_v56  ;;  %v511_v34 = vmul.f32 0.5, %v510_v40  ;;  %v530_v51 = vmul.f32 %v1238_v57, %v529_v16  ;;  %v656_v26 = vperm.slane %v487_v18, %v1240_v2  ;;  %vm1346_vm1 = vmor %vm524_vm13, %vm525_vm14 }
  0x9c   :  { %v1245_v59 = vmax.f32 %v438_v48, 1e-16  ;;  %v1247_v22 = vpop.eup %769  ;;  %v440_v21 = vpop.xlane.xlu1 %439  ;;  %v502_v0 = vsub.f32 1.5, %v501_v58  ;;  %v521_v43 = vmul.f32 0.5, %v520_v1  ;;  %vm671_vm2 = vcmask 326912  }
  0x9d   :  { %v1257_v36 = vmax.f32 %v440_v21, 1e-16  ;;  %v1259_v39 = vpop.eup %771  ;;  %v539_v44 = vmul.f32 %v1247_v22, %v1219_v55  ;;  %v493_v20 = vmul.f32 %v1205_v38, %v492_v15  ;;  %v512_v9 = vsub.f32 1.5, %v511_v34 }
  0x9e   :  { %v442_v35 = vpop.xlane.xlu2 %441  ;;  %775 = vrsqrt.f32 %v1245_v59  ;;  %v503_v5 = vmul.f32 %v1209_v42, %v502_v0  ;;  %v549_v10 = vmul.f32 %v1259_v39, %v1228_v41  ;;  %v522_v13 = vsub.f32 1.5, %v521_v43 }
  0x9f   :  { %v1287_v8 = vmax.f32 %v442_v35, 1e-16  ;;  %v1289_v4 = vpop.eup %773  ;;  %777 = vrsqrt.f32 %v1257_v36  ;;  %v540_v14 = vmul.f32 %v1247_v22, %v539_v44  ;;  %v497_v17 = vsel %vm1283_vm8, %v1205_v38, %v493_v20 }
  0xa0   :  { %v531_v24 = vmul.f32 0.5, %v530_v51  ;;  %v559_v54 = vmul.f32 %v1289_v4, %v1236_v6  ;;  %v507_v32 = vsel %vm1297_vm9, %v1209_v42, %v503_v5  ;;  %v513_v38 = vmul.f32 %v1221_v62, %v512_v9 }
  0xa1   :  { %779 = vrsqrt.f32 %v1287_v8  ;;  %v550_v61 = vmul.f32 %v1259_v39, %v549_v10  ;;  %v658_v29 = vperm.slane %v497_v17, %v657_v7  ;;  %v541_v42 = vmul.f32 0.5, %v540_v14 }
  0xa2   :  { %v523_v49 = vmul.f32 %v1224_v25, %v522_v13  ;;  %v532_v11 = vsub.f32 1.5, %v531_v24  ;;  %v662_v58 = vperm.slane %v507_v32, %v661_v30  ;;  %v673_v40 = vadd.s32 4294967256, %v1240_v2 }
  0xa3   :  { %v444_v52 = vpop.xlane.xlu0 %443  ;;  %vm534_vm3 = vweird.f32 %v1211_v46  ;;  %v560_v1 = vmul.f32 %v1289_v4, %v559_v54  ;;  %v517_v60 = vsel %vm1330_vm0, %v1221_v62, %v513_v38  ;;  %vm535_vm4 = vweird.f32 %v1238_v57 }
  0xa4   :  { %v1310_v37 = vmax.f32 %v444_v52, 1e-16  ;;  %v1312_v47 = vpop.eup %775  ;;  %v446_v63 = vpop.xlane.xlu1 %445  ;;  %v551_v15 = vmul.f32 0.5, %v550_v61  ;;  %v660_v30 = vsel %vm659_vm7, %v658_v29, %v656_v26  ;;  %v542_v35 = vsub.f32 1.5, %v541_v42  ;;  %vm1375_vm7 = vmor %vm534_vm3, %vm535_vm4 }
  0xa5   :  { %v1334_v28 = vmax.f32 %v446_v63, 1e-16  ;;  %v1336_v48 = vpop.eup %777  ;;  %v569_v56 = vmul.f32 %v1312_v47, %v1245_v59  ;;  %v527_v62 = vsel %vm1346_vm1, %v1224_v25, %v523_v49  ;;  %vm675_vm5 = vcmask 392512  }
  0xa6   :  { %v448_v19 = vpop.xlane.xlu2 %447  ;;  %781 = vrsqrt.f32 %v1310_v37  ;;  %v579_v0 = vmul.f32 %v1336_v48, %v1257_v36  ;;  %v533_v34 = vmul.f32 %v1238_v57, %v532_v11  ;;  %vm544_vm6 = vweird.f32 %v1219_v55 }
  0xa7   :  { %v1357_v16 = vmax.f32 %v448_v19, 1e-16  ;;  %v1359_v21 = vpop.eup %779  ;;  %783 = vrsqrt.f32 %v1334_v28  ;;  %v570_v43 = vmul.f32 %v1312_v47, %v569_v56  ;;  %v666_v44 = vperm.slane %v517_v60, %v665_v50 }
  0xa8   :  { %vm545_vm8 = vweird.f32 %v1247_v22  ;;  %v561_v31 = vmul.f32 0.5, %v560_v1  ;;  %v664_v51 = vsel %vm663_vm10, %v662_v58, %v660_v30  ;;  %v552_v52 = vsub.f32 1.5, %v551_v15 }
  0xa9   :  { %v589_v7 = vmul.f32 %v1359_v21, %v1287_v8  ;;  %785 = vrsqrt.f32 %v1357_v16  ;;  %v677_v46 = vadd.s32 4294967248, %v1240_v2  ;;  %v543_v3 = vmul.f32 %v1247_v22, %v542_v35  ;;  %vm1398_vm10 = vmor %vm544_vm6, %vm545_vm8 }
  0xaa   :  { %vm554_vm9 = vweird.f32 %v1228_v41  ;;  %v580_v5 = vmul.f32 %v1336_v48, %v579_v0  ;;  %v670_v9 = vperm.slane %v527_v62, %v1276_v53  ;;  %v537_v10 = vsel %vm1375_vm7, %v1238_v57, %v533_v34 }
  0xab   :  { %v450_v27 = vpop.xlane.xlu0 %449  ;;  %vm555_vm11 = vweird.f32 %v1259_v39  ;;  %v571_v13 = vmul.f32 0.5, %v570_v43  ;;  %v668_v18 = vsel %vm667_vm15, %v666_v44, %v664_v51  ;;  %v562_v17 = vsub.f32 1.5, %v561_v31 }
  0xac   :  { %v1380_v25 = vmax.f32 %v450_v27, 1e-16  ;;  %v1382_v20 = vpop.eup %781  ;;  %v402_v57 = vpop.xlane.xlu1 %401  ;;  %vm679_vm12 = vcmask 458112   ;;  %v553_v55 = vmul.f32 %v1259_v39, %v552_v52  ;;  %vm564_vm13 = vweird.f32 %v1236_v6  ;;  %vm1417_vm14 = vmor %vm554_vm9, %vm555_vm11 }
  0xad   :  { %v1403_v14 = vpop.eup %783  ;;  %v599_v53 = vmul.f32 %v1382_v20, %v1310_v37  ;;  %v590_v24 = vmul.f32 %v1359_v21, %v589_v7  ;;  %v674_v50 = vperm.slane %v537_v10, %v673_v40  ;;  %v547_v54 = vsel %vm1398_vm10, %v1247_v22, %v543_v3 }
  0xae   :  { %787 = vrsqrt.f32 %v1380_v25  ;;  %vm565_vm15 = vweird.f32 %v1289_v4  ;;  %v581_v38 = vmul.f32 0.5, %v580_v5  ;;  %v672_v63 = vsel %vm671_vm2, %v670_v9, %v668_v18 }
  0xaf   :  { %v1422_v61 = vpop.eup %785  ;;  %v572_v26 = vsub.f32 1.5, %v571_v13  ;;  %v609_v29 = vmul.f32 %v1403_v14, %v1334_v28  ;;  %v1427_v33 = vmax.f32 %v402_v57, 1e-16  ;;  %v681_v22 = vadd.s32 4294967240, %v1240_v2  ;;  %vm1438_vm1 = vmor %vm564_vm13, %vm565_vm15 }
  0xb0   :  { %v563_v41 = vmul.f32 %v1289_v4, %v562_v17  ;;  %vm574_vm0 = vweird.f32 %v1245_v59  ;;  %v600_v42 = vmul.f32 %v1382_v20, %v599_v53  ;;  %v678_v19 = vperm.slane %v547_v54, %v677_v46 }
  0xb1   :  { %v557_v49 = vsel %vm1417_vm14, %v1259_v39, %v553_v55  ;;  %vm575_vm2 = vweird.f32 %v1312_v47  ;;  %v591_v56 = vmul.f32 0.5, %v590_v24  ;;  %v676_v23 = vsel %vm675_vm5, %v674_v50, %v672_v63 }
  0xb2   :  { %v685_v40 = vadd.s32 4294967232, %v1240_v2  ;;  %v582_v1 = vsub.f32 1.5, %v581_v38  ;;  %v619_v60 = vmul.f32 %v1422_v61, %v1357_v16  ;;  %v573_v39 = vmul.f32 %v1312_v47, %v572_v26  ;;  %vm1458_vm4 = vmor %vm574_vm0, %vm575_vm2 }
  0xb3   :  { %vm584_vm3 = vweird.f32 %v1257_v36  ;;  %v610_v6 = vmul.f32 %v1403_v14, %v609_v29  ;;  %789 = vrsqrt.f32 %v1427_v33  ;;  %v682_v15 = vperm.slane %v557_v49, %v681_v22 }
  0xb4   :  { %v1443_v58 = vpop.eup %787  ;;  %v567_v27 = vsel %vm1438_vm1, %v1289_v4, %v563_v41  ;;  %vm585_vm5 = vweird.f32 %v1336_v48  ;;  %v601_v35 = vmul.f32 0.5, %v600_v42  ;;  %v680_v0 = vsel %vm679_vm12, %v678_v19, %v676_v23 }
  0xb5   :  { %vm683_vm6 = vcmask 523712   ;;  %v592_v62 = vsub.f32 1.5, %v591_v56  ;;  %v629_v34 = vmul.f32 %v1443_v58, %v1380_v25  ;;  %v689_v43 = vadd.s32 4294967224, %v1240_v2  ;;  %vm1475_vm8 = vmor %vm584_vm3, %vm585_vm5 }
  0xb6   :  { %v583_v4 = vmul.f32 %v1336_v48, %v582_v1  ;;  %vm594_vm7 = vweird.f32 %v1287_v8  ;;  %v620_v59 = vmul.f32 %v1422_v61, %v619_v60  ;;  %v686_v44 = vperm.slane %v567_v27, %v685_v40 }
  0xb7   :  { %v577_v45 = vsel %vm1458_vm4, %v1312_v47, %v573_v39  ;;  %vm595_vm9 = vweird.f32 %v1359_v21  ;;  %v611_v51 = vmul.f32 0.5, %v610_v6  ;;  %v684_v52 = vsel %vm683_vm6, %v682_v15, %v680_v0 }
  0xb8   :  { %vm687_vm10 = vcmask 589312   ;;  %v602_v7 = vsub.f32 1.5, %v601_v35  ;;  %v693_v3 = vadd.s32 4294967216, %v1240_v2  ;;  %v593_v5 = vmul.f32 %v1359_v21, %v592_v62  ;;  %vm1491_vm12 = vmor %vm594_vm7, %vm595_vm9 }
  0xb9   :  { %v1480_v46 = vpop.eup %789  ;;  %vm604_vm11 = vweird.f32 %v1310_v37  ;;  %v630_v36 = vmul.f32 %v1443_v58, %v629_v34  ;;  %v690_v47 = vperm.slane %v577_v45, %v689_v43  ;;  %v587_v9 = vsel %vm1475_vm8, %v1336_v48, %v583_v4 }
  0xba   :  { %vm605_vm13 = vweird.f32 %v1382_v20  ;;  %v621_v12 = vmul.f32 0.5, %v620_v59  ;;  %v688_v13 = vsel %vm687_vm10, %v686_v44, %v684_v52  ;;  %vm691_vm14 = vcmask 654912  }
  0xbb   :  { %v612_v18 = vsub.f32 1.5, %v611_v51  ;;  %v697_v17 = vadd.s32 4294967208, %v1240_v2  ;;  %v603_v53 = vmul.f32 %v1382_v20, %v602_v7  ;;  %vm614_vm15 = vweird.f32 %v1334_v28  ;;  %vm1506_vm0 = vmor %vm604_vm11, %vm605_vm13 }
  0xbc   :  { %v453_v48 = vmul.f32 %v1480_v46, %v1427_v33  ;;  %v694_v8 = vperm.slane %v587_v9, %v693_v3  ;;  %v597_v57 = vsel %vm1491_vm12, %v1359_v21, %v593_v5  ;;  %vm615_vm1 = vweird.f32 %v1403_v14 }
  0xbd   :  { %v631_v24 = vmul.f32 0.5, %v630_v36  ;;  %v692_v50 = vsel %vm691_vm14, %v690_v47, %v688_v13  ;;  %vm695_vm2 = vcmask 720512   ;;  %v622_v54 = vsub.f32 1.5, %v621_v12  ;;  %vm1519_vm4 = vmor %vm614_vm15, %vm615_vm1 }
  0xbe   :  { %v701_v32 = vadd.s32 4294967200, %v1240_v2  ;;  %v613_v38 = vmul.f32 %v1403_v14, %v612_v18  ;;  %vm624_vm3 = vweird.f32 %v1357_v16  ;;  %v698_v63 = vperm.slane %v597_v57, %v697_v17 }
  0xbf   :  { %v607_v37 = vsel %vm1506_vm0, %v1382_v20, %v603_v53  ;;  %vm625_vm5 = vweird.f32 %v1422_v61  ;;  %v454_v26 = vmul.f32 %v1480_v46, %v453_v48  ;;  %v696_v29 = vsel %vm695_vm2, %v694_v8, %v692_v50 }
  0xc0   :  { %vm699_vm6 = vcmask 786112   ;;  %v632_v22 = vsub.f32 1.5, %v631_v24  ;;  %v705_v16 = vadd.s32 4294967192, %v1240_v2  ;;  %v623_v41 = vmul.f32 %v1422_v61, %v622_v54  ;;  %vm1530_vm7 = vmor %vm624_vm3, %vm625_vm5 }
  0xc1   :  { %v702_v19 = vperm.slane %v607_v37, %v701_v32  ;;  %v617_v28 = vsel %vm1519_vm4, %v1403_v14, %v613_v38  ;;  %vm634_vm8 = vweird.f32 %v1380_v25  ;;  %vm635_vm9 = vweird.f32 %v1443_v58 }
  0xc2   :  { %v700_v49 = vsel %vm699_vm6, %v698_v63, %v696_v29  ;;  %v455_v11 = vmul.f32 0.5, %v454_v26  ;;  %vm703_vm10 = vcmask 851712   ;;  %v709_v23 = vadd.s32 4294967184, %v1240_v2  ;;  %vm636_vm11 = vmor %vm634_vm8, %vm635_vm9 }
  0xc3   :  { %v633_v40 = vmul.f32 %v1443_v58, %v632_v22  ;;  %v706_v60 = vperm.slane %v617_v28, %v705_v16  ;;  %v627_v14 = vsel %vm1530_vm7, %v1422_v61, %v623_v41  ;;  %v704_v6 = vsel %vm703_vm10, %v702_v19, %v700_v49 }
  0xc4   :  { %vm707_vm12 = vcmask 917312   ;;  %v713_v25 = vadd.s32 4294967176, %v1240_v2  ;;  %v456_v15 = vsub.f32 1.5, %v455_v11  ;;  %v710_v27 = vperm.slane %v627_v14, %v709_v23 }
  0xc5   :  { %v637_v30 = vsel %vm636_vm11, %v1443_v58, %v633_v40  ;;  %vm458_vm13 = vweird.f32 %v1427_v33  ;;  %vm459_vm14 = vweird.f32 %v1480_v46  ;;  %v708_v62 = vsel %vm707_vm12, %v706_v60, %v704_v6 }
  0xc6   :  { %vm711_vm15 = vcmask 982912   ;;  %v714_v34 = vperm.slane %v637_v30, %v713_v25  ;;  %v457_v61 = vmul.f32 %v1480_v46, %v456_v15  ;;  %vm460_vm0 = vmor %vm458_vm13, %vm459_vm14  ;;  %vm715_vm1 = vcmask 1048512  }
  0xc7   :  { %v712_v4 = vsel %vm711_vm15, %v710_v27, %v708_v62 }
  0xc8   :  { %v461_v59 = vsel %vm460_vm0, %v1480_v46, %v457_v61  ;;  %v716_v44 = vsel %vm715_vm1, %v714_v34, %v712_v4 }
  0xc9   :  { %v730_v33 = vmul.f32 %v716_v44, %v461_v59 }
  0xd2   :  { %v198_v42 = vpop.f32.mrf.mxu1  ;;  %v252_v39 = vpop.f32.mrf.mxu2 }
  0xd9   :  { %v97_v56 = vpop.f32.mrf.mxu0 }
  0xda   :  { %v199_v1 = vadd.f32 %v198_v42, %v97_v56 }
  0xdb   :  { %v291_v0 = vpop.f32.mrf.mxu3 }
  0xdc   :  { %v253_v35 = vadd.f32 %v252_v39, %v199_v1 }
  0xde   :  { %v292_v43 = vadd.f32 %v291_v0, %v253_v35 }
 0x10a   :  { %v360_v2 = vpop.f32.mrf.mxu0 }
 0x10b   :  { %v361_v58 = vadd.f32 %v360_v2, %v292_v43 }
 0x112   :  { %v397_v45 = vpop.f32.mrf.mxu1 }
 0x113   :  { %v398_v31 = vadd.f32 %v397_v45, %v361_v58 }
 0x115   :  { %v731_v51 = vmul.f32 %v730_v33, %v398_v31 }
 0x117   :  { %v732_v52 = vmul.f32 20.0, %v731_v51 }
 0x119   :  { %733 = vst [vmem:[#allocation7] sm:$0xff] %v732_v52 }
 0x11a   :  { %744 = dma.vmem_to_hbm [thread:$0]  %s740_s1, 128, %s742_s23, [#allocation4]  }
 0x11b   :  { %867 = dma.done.wait [#allocation4], 128  }
 0x11c   :  { %868 = vsyncadd [#allocation4], 4294967168 }
 0x11d   :  { %749 = vsyncpa [#allocation3], 1 }
 0x11e   :  { %750 = vsyncpa [#allocation6], 1 }
 0x11f   :  { %751 = vsyncpa [#allocation4], 1 }

</bundles_post_ra>
